<compile_context>
chip_gen: v6e
topology: v6e:2x2x1
jax: 0.10.0
libtpu: 0.0.40
codegen_flags: <defaults>
</compile_context>

<pallas_src>
import functools
import math

import numpy as np
import jax
import jax.numpy as jnp
from jax import lax
from jax.experimental import pallas as pl
from jax.experimental.pallas import tpu as pltpu


def _cdiv(a, b):
    return -(-a // b)


def _round_up(a, b):
    return _cdiv(a, b) * b


def _decode_kernel(x_ref, w_ref, b_ref, base_ref, out_ref, idx_ref, s_ref,
                   *, kconv, cin_pad, cout_pad, wh, wo):
    """Fused conv (in-kernel patch build + one MXU matmul) + bias + ReLU +
    2x2 max-pool with PyTorch-style flat indices.

    x_ref:    [2, 2, C_in_pad, L]           f32  parity planes of the input
    w_ref:    [4*C_out_pad, E*C_in_pad]     f32  per-pool-offset conv weights
    b_ref:    [4*C_out_pad, 1]              f32  bias (tiled over offsets)
    base_ref: [1, L]                        i32  (2*i)*Wo + 2*j per lane
    out_ref:  [C_out_pad, L]                f32  pooled activations
    idx_ref:  [C_out_pad, L]                i32  argmax indices
    s_ref:    [E*C_in_pad, L] VMEM scratch  f32  patch matrix
    """
    kp1 = kconv + 1

    # ---- build the patch matrix in VMEM from statically shifted plane slices ----
    for p in range(2):
        for q in range(2):
            plane = x_ref[p, q]                                   # (C_in_pad, L)
            for vr in range(p, kp1, 2):
                for vc in range(q, kp1, 2):
                    delta = (vr // 2) * wh + (vc // 2)
                    r0 = (vr * kp1 + vc) * cin_pad
                    if delta == 0:
                        s_ref[r0:r0 + cin_pad, :] = plane
                    else:
                        shifted = jnp.concatenate(
                            [plane[:, delta:],
                             jnp.zeros((cin_pad, delta), plane.dtype)],
                            axis=1)
                        s_ref[r0:r0 + cin_pad, :] = shifted

    # ---- conv for all 4 pool-window offsets in ONE MXU matmul ----
    r = jnp.dot(w_ref[...], s_ref[...], preferred_element_type=jnp.float32)
    r = jnp.maximum(r + b_ref[...], 0.0)                          # (4*C_out_pad, L)

    # ---- 2x2 max-pool, PyTorch first-max tie-break, flat conv-plane indices ----
    offs = (0, 1, wo, wo + 1)            # (di,dj) = (0,0),(0,1),(1,0),(1,1)
    best = r[0:cout_pad, :]
    best_off = jnp.zeros(best.shape, jnp.int32)
    for d in range(1, 4):
        cand = r[d * cout_pad:(d + 1) * cout_pad, :]
        gt = cand > best
        best = jnp.where(gt, cand, best)
        best_off = jnp.where(gt, offs[d], best_off)
    out_ref[...] = best
    idx_ref[...] = base_ref[...] + best_off


def _tpu_vmem_and_cores():
    """(physical VMEM bytes, #TensorCores per chip) with a safe fallback."""
    try:
        phys = int(pltpu.get_tpu_info().vmem_capacity_bytes)
    except Exception:
        phys = 64 * 1024 * 1024                      # conservative (v7x-sized)
    # v7x is the generation pairing ~64 MiB VMEM with 2 TensorCores per chip.
    return phys, (2 if phys <= 64 * 1024 * 1024 else 1)


def decode_layer_forward(x, weight, bias, *, conv_kernel=5, pool_kernel=2):
    """Pallas equivalent of DecodeLayer.forward. Returns (pooled, (shape, indices))."""
    assert pool_kernel == 2, "kernel written for MaxPool2d(2)"
    N, C_in, H, W = x.shape
    C_out = weight.shape[0]
    K = conv_kernel
    Ho, Wo = H - K + 1, W - K + 1
    Hp, Wp = Ho // 2, Wo // 2
    Hh, Wh = (H + 1) // 2, (W + 1) // 2          # parity-plane (half) extents
    KP1 = K + 1
    E = KP1 * KP1                                # distinct (row, col) shift slots
    C_in_pad = _round_up(max(C_in, 8), 8)
    C_out_pad = _round_up(max(C_out, 8), 8)
    L_img = Hh * Wh                              # lanes per image

    # ---- glue: space-to-depth into the 4 parity planes (~1x input bytes) ----
    xpad = jnp.pad(x.astype(jnp.float32),
                   ((0, 0), (0, 0), (0, 2 * Hh - H), (0, 2 * Wh - W)))
    planes = xpad.reshape(N, C_in, Hh, 2, Wh, 2).transpose(3, 5, 0, 1, 2, 4)
    planes = planes.reshape(2, 2, N, C_in, L_img)
    planes = jnp.pad(planes,
                     ((0, 0), (0, 0), (0, 0), (0, C_in_pad - C_in), (0, 0)))

    # ---- glue: per-pool-offset conv weights in the patch-matrix layout ----
    wt = weight.astype(jnp.float32).transpose(2, 3, 1, 0)        # (K, K, C_in, C_out)
    wfull = jnp.zeros((2, 2, KP1, KP1, C_in_pad, C_out), jnp.float32)
    for di in range(2):
        for dj in range(2):
            wfull = wfull.at[di, dj, di:di + K, dj:dj + K, :C_in, :].set(wt)
    wbig = wfull.transpose(0, 1, 5, 2, 3, 4).reshape(4, C_out, E * C_in_pad)
    wbig = jnp.pad(wbig, ((0, 0), (0, C_out_pad - C_out), (0, 0)))
    wbig = wbig.reshape(4 * C_out_pad, E * C_in_pad)

    b_pad = jnp.pad(bias.astype(jnp.float32), (0, C_out_pad - C_out))
    b_all = jnp.tile(b_pad, 4).reshape(4 * C_out_pad, 1)

    # per-lane pooled-position base index (2*i)*Wo + 2*j (garbage where i>=Hp / j>=Wp)
    i2 = jnp.arange(Hh, dtype=jnp.int32)
    j2 = jnp.arange(Wh, dtype=jnp.int32)
    base_img = (2 * i2[:, None] * Wo + 2 * j2[None, :]).reshape(1, L_img)

    # ---- tiling: footprint-aware images-per-step, per-generation VMEM budget ----
    vmem_phys, num_tc = _tpu_vmem_and_cores()
    vmem_limit = min(vmem_phys * 3 // 4, 100 * 1024 * 1024)
    bytes_per_lane = 4 * (2 * 4 * C_in_pad         # parity planes (double-buffered)
                          + 2 * E * C_in_pad       # patch scratch + matmul staging
                          + 4 * C_out_pad          # conv result
                          + 2 * 2 * C_out_pad      # two outputs (double-buffered)
                          ) + 2 * 4                # base row (i32, double-buffered)
    budget_lanes = max(L_img, (vmem_limit * 2 // 3) // bytes_per_lane)
    g = 128 // math.gcd(L_img, 128)                # image granule for 128-lane blocks
    ipb_cap = max(1, budget_lanes // L_img)
    if ipb_cap >= N:
        ipb = N
        if num_tc > 1 and N >= 2 * g:              # split only when megacore can use it
            ipb = max(g, (_cdiv(N, num_tc) // g) * g)
    else:
        ipb = max(g, (ipb_cap // g) * g)
    n_steps = _cdiv(N, ipb)
    N_pad = n_steps * ipb
    # TODO(synk): very large single images (ipb*L_img over the VMEM budget) would
    # need halo'd spatial tiling within an image; not required at these sizes.

    if N_pad != N:
        planes = jnp.pad(planes, ((0, 0), (0, 0), (0, N_pad - N), (0, 0), (0, 0)))
    planes = planes.transpose(0, 1, 3, 2, 4).reshape(2, 2, C_in_pad, N_pad * L_img)
    base = jnp.tile(base_img, (1, N_pad))

    L_tot = N_pad * L_img
    L_blk = ipb * L_img

    kernel = functools.partial(_decode_kernel, kconv=K, cin_pad=C_in_pad,
                               cout_pad=C_out_pad, wh=Wh, wo=Wo)
    pooled_t, idx_t = pl.pallas_call(
        kernel,
        grid=(n_steps,),
        in_specs=[
            pl.BlockSpec((2, 2, C_in_pad, L_blk), lambda m: (0, 0, 0, m)),
            pl.BlockSpec((4 * C_out_pad, E * C_in_pad), lambda m: (0, 0)),
            pl.BlockSpec((4 * C_out_pad, 1), lambda m: (0, 0)),
            pl.BlockSpec((1, L_blk), lambda m: (0, m)),
        ],
        out_specs=[
            pl.BlockSpec((C_out_pad, L_blk), lambda m: (0, m)),
            pl.BlockSpec((C_out_pad, L_blk), lambda m: (0, m)),
        ],
        out_shape=[
            jax.ShapeDtypeStruct((C_out_pad, L_tot), jnp.float32),
            jax.ShapeDtypeStruct((C_out_pad, L_tot), jnp.int32),
        ],
        scratch_shapes=[pltpu.VMEM((E * C_in_pad, L_blk), jnp.float32)],
        compiler_params=pltpu.CompilerParams(
            dimension_semantics=("parallel",),
            vmem_limit_bytes=int(vmem_limit),
        ),
    )(planes, wbig, b_all, base)

    # ---- glue: strip padding / invalid positions, back to NCHW ----
    pooled = (pooled_t.reshape(C_out_pad, N_pad, Hh, Wh)[:C_out, :N, :Hp, :Wp]
              .transpose(1, 0, 2, 3))
    indices = (idx_t.reshape(C_out_pad, N_pad, Hh, Wh)[:C_out, :N, :Hp, :Wp]
               .transpose(1, 0, 2, 3))
    shape_before_pool = (N, C_out, Ho, Wo)       # `shape` captured pre-pool in torch
    # TODO(synk): PyTorch returns int64 indices; int32 used here (x64 disabled).
    return pooled, (shape_before_pool, indices)


if __name__ == "__main__":
    key = jax.random.PRNGKey(0)
    k1, k2, k3 = jax.random.split(key, 3)

    N, C_in, H, W = 2, 3, 16, 16
    C_out, K = 6, 5

    x = jax.random.normal(k1, (N, C_in, H, W), dtype=jnp.float32)
    fan_in = C_in * K * K
    bound = 1.0 / np.sqrt(fan_in)
    weight = jax.random.uniform(k2, (C_out, C_in, K, K), jnp.float32, -bound, bound)
    bias = jax.random.uniform(k3, (C_out,), jnp.float32, -bound, bound)

    pooled, (shape_before, indices) = decode_layer_forward(
        x, weight, bias, conv_kernel=K, pool_kernel=2)
    jax.block_until_ready(pooled)
    jax.block_until_ready(indices)

    # ---- lightweight self-check against a plain-JAX reference ----
    conv = lax.conv_general_dilated(
        x, weight, (1, 1), "VALID", dimension_numbers=("NCHW", "OIHW", "NCHW"))
    r = jnp.maximum(conv + bias[None, :, None, None], 0.0)
    Ho, Wo = H - K + 1, W - K + 1
    Hp, Wp = Ho // 2, Wo // 2
    r4 = (r[:, :, :2 * Hp, :2 * Wp]
          .reshape(N, C_out, Hp, 2, Wp, 2)
          .transpose(0, 1, 2, 4, 3, 5)
          .reshape(N, C_out, Hp, Wp, 4))
    pooled_ref = r4.max(axis=-1)
    arg = jnp.argmax(r4, axis=-1).astype(jnp.int32)
    di, dj = arg // 2, arg % 2
    ii = lax.broadcasted_iota(jnp.int32, (N, C_out, Hp, Wp), 2)
    jj = lax.broadcasted_iota(jnp.int32, (N, C_out, Hp, Wp), 3)
    idx_ref = (2 * ii + di) * Wo + (2 * jj + dj)

    assert shape_before == (N, C_out, Ho, Wo)
    assert pooled.shape == (N, C_out, Hp, Wp)
    assert indices.shape == (N, C_out, Hp, Wp)
    np.testing.assert_allclose(np.asarray(pooled), np.asarray(pooled_ref),
                               rtol=2e-2, atol=2e-2)
    match = float(np.mean(np.asarray(indices) == np.asarray(idx_ref)))
    assert match > 0.9, f"index match rate too low: {match}"

    print("KERNEL_OK")
</pallas_src>

<mosaic_0001>
module attributes {stable_mosaic.version = 11 : i64} {
  func.func @_decode_kernel(%arg0: i32, %arg1: memref<2x2x8x128xf32, #tpu.memory_space<vmem>>, %arg2: memref<32x288xf32, #tpu.memory_space<vmem>>, %arg3: memref<32x1xf32, #tpu.memory_space<vmem>>, %arg4: memref<1x128xi32, #tpu.memory_space<vmem>>, %arg5: memref<8x128xf32, #tpu.memory_space<vmem>>, %arg6: memref<8x128xi32, #tpu.memory_space<vmem>>, %arg7: memref<288x128xf32, #tpu.memory_space<vmem>>) attributes {dimension_semantics = [#tpu.dimension_semantics<parallel>], iteration_bounds = array<i64: 1>, scalar_prefetch = 0 : i64, scratch_operands = 1 : i64, tpu.core_type = #tpu.core_type<tc>, window_params = [{transform_indices = @transform_0, window_bounds = array<i64: 2, 2, 8, 128>}, {pipeline_mode = #tpu.pipeline_mode<synchronous>, transform_indices = @transform_1, window_bounds = array<i64: 32, 288>}, {pipeline_mode = #tpu.pipeline_mode<synchronous>, transform_indices = @transform_2, window_bounds = array<i64: 32, 1>}, {transform_indices = @transform_3, window_bounds = array<i64: 1, 128>}, {transform_indices = @transform_4, window_bounds = array<i64: 8, 128>}, {transform_indices = @transform_5, window_bounds = array<i64: 8, 128>}]} {
    %c0 = arith.constant 0 : index
    %c0_0 = arith.constant 0 : index
    %c0_1 = arith.constant 0 : index
    %c0_2 = arith.constant 0 : index
    %0 = vector.load %arg1[%c0, %c0_0, %c0_1, %c0_2] : memref<2x2x8x128xf32, #tpu.memory_space<vmem>>, vector<1x1x8x128xf32>
    %1 = vector.shape_cast %0 : vector<1x1x8x128xf32> to vector<8x128xf32>
    %c0_3 = arith.constant 0 : index
    %c0_4 = arith.constant 0 : index
    %2 = vector.load %arg7[%c0_3, %c0_4] : memref<288x128xf32, #tpu.memory_space<vmem>>, vector<8x128xf32>
    tpu.vector_store %arg7[%c0_3, %c0_4], %1 {strides = array<i32>} : memref<288x128xf32, #tpu.memory_space<vmem>>, vector<8x128xf32>,
    %3 = vector.extract_strided_slice %1 {offsets = [0, 1], sizes = [8, 127], strides = [1, 1]} : vector<8x128xf32> to vector<8x127xf32>
    %cst = arith.constant 0.000000e+00 : f32
    %4 = vector.broadcast %cst : f32 to vector<8x1xf32>
    %5 = tpu.concatenate %3, %4 in 1 : vector<8x127xf32>, vector<8x1xf32> -> vector<8x128xf32>
    %c16 = arith.constant 16 : index
    %c0_5 = arith.constant 0 : index
    %6 = vector.load %arg7[%c16, %c0_5] : memref<288x128xf32, #tpu.memory_space<vmem>>, vector<8x128xf32>
    tpu.vector_store %arg7[%c16, %c0_5], %5 {strides = array<i32>} : memref<288x128xf32, #tpu.memory_space<vmem>>, vector<8x128xf32>,
    %7 = vector.extract_strided_slice %1 {offsets = [0, 2], sizes = [8, 126], strides = [1, 1]} : vector<8x128xf32> to vector<8x126xf32>
    %cst_6 = arith.constant 0.000000e+00 : f32
    %8 = vector.broadcast %cst_6 : f32 to vector<8x2xf32>
    %9 = tpu.concatenate %7, %8 in 1 : vector<8x126xf32>, vector<8x2xf32> -> vector<8x128xf32>
    %c32 = arith.constant 32 : index
    %c0_7 = arith.constant 0 : index
    %10 = vector.load %arg7[%c32, %c0_7] : memref<288x128xf32, #tpu.memory_space<vmem>>, vector<8x128xf32>
    tpu.vector_store %arg7[%c32, %c0_7], %9 {strides = array<i32>} : memref<288x128xf32, #tpu.memory_space<vmem>>, vector<8x128xf32>,
    %11 = vector.extract_strided_slice %1 {offsets = [0, 8], sizes = [8, 120], strides = [1, 1]} : vector<8x128xf32> to vector<8x120xf32>
    %cst_8 = arith.constant 0.000000e+00 : f32
    %12 = vector.broadcast %cst_8 : f32 to vector<8x8xf32>
    %13 = tpu.concatenate %11, %12 in 1 : vector<8x120xf32>, vector<8x8xf32> -> vector<8x128xf32>
    %c96 = arith.constant 96 : index
    %c0_9 = arith.constant 0 : index
    %14 = vector.load %arg7[%c96, %c0_9] : memref<288x128xf32, #tpu.memory_space<vmem>>, vector<8x128xf32>
    tpu.vector_store %arg7[%c96, %c0_9], %13 {strides = array<i32>} : memref<288x128xf32, #tpu.memory_space<vmem>>, vector<8x128xf32>,
    %15 = vector.extract_strided_slice %1 {offsets = [0, 9], sizes = [8, 119], strides = [1, 1]} : vector<8x128xf32> to vector<8x119xf32>
    %cst_10 = arith.constant 0.000000e+00 : f32
    %16 = vector.broadcast %cst_10 : f32 to vector<8x9xf32>
    %17 = tpu.concatenate %15, %16 in 1 : vector<8x119xf32>, vector<8x9xf32> -> vector<8x128xf32>
    %c112 = arith.constant 112 : index
    %c0_11 = arith.constant 0 : index
    %18 = vector.load %arg7[%c112, %c0_11] : memref<288x128xf32, #tpu.memory_space<vmem>>, vector<8x128xf32>
    tpu.vector_store %arg7[%c112, %c0_11], %17 {strides = array<i32>} : memref<288x128xf32, #tpu.memory_space<vmem>>, vector<8x128xf32>,
    %19 = vector.extract_strided_slice %1 {offsets = [0, 10], sizes = [8, 118], strides = [1, 1]} : vector<8x128xf32> to vector<8x118xf32>
    %cst_12 = arith.constant 0.000000e+00 : f32
    %20 = vector.broadcast %cst_12 : f32 to vector<8x10xf32>
    %21 = tpu.concatenate %19, %20 in 1 : vector<8x118xf32>, vector<8x10xf32> -> vector<8x128xf32>
    %c128 = arith.constant 128 : index
    %c0_13 = arith.constant 0 : index
    %22 = vector.load %arg7[%c128, %c0_13] : memref<288x128xf32, #tpu.memory_space<vmem>>, vector<8x128xf32>
    tpu.vector_store %arg7[%c128, %c0_13], %21 {strides = array<i32>} : memref<288x128xf32, #tpu.memory_space<vmem>>, vector<8x128xf32>,
    %23 = vector.extract_strided_slice %1 {offsets = [0, 16], sizes = [8, 112], strides = [1, 1]} : vector<8x128xf32> to vector<8x112xf32>
    %cst_14 = arith.constant 0.000000e+00 : f32
    %24 = vector.broadcast %cst_14 : f32 to vector<8x16xf32>
    %25 = tpu.concatenate %23, %24 in 1 : vector<8x112xf32>, vector<8x16xf32> -> vector<8x128xf32>
    %c192 = arith.constant 192 : index
    %c0_15 = arith.constant 0 : index
    %26 = vector.load %arg7[%c192, %c0_15] : memref<288x128xf32, #tpu.memory_space<vmem>>, vector<8x128xf32>
    tpu.vector_store %arg7[%c192, %c0_15], %25 {strides = array<i32>} : memref<288x128xf32, #tpu.memory_space<vmem>>, vector<8x128xf32>,
    %27 = vector.extract_strided_slice %1 {offsets = [0, 17], sizes = [8, 111], strides = [1, 1]} : vector<8x128xf32> to vector<8x111xf32>
    %cst_16 = arith.constant 0.000000e+00 : f32
    %28 = vector.broadcast %cst_16 : f32 to vector<8x17xf32>
    %29 = tpu.concatenate %27, %28 in 1 : vector<8x111xf32>, vector<8x17xf32> -> vector<8x128xf32>
    %c208 = arith.constant 208 : index
    %c0_17 = arith.constant 0 : index
    %30 = vector.load %arg7[%c208, %c0_17] : memref<288x128xf32, #tpu.memory_space<vmem>>, vector<8x128xf32>
    tpu.vector_store %arg7[%c208, %c0_17], %29 {strides = array<i32>} : memref<288x128xf32, #tpu.memory_space<vmem>>, vector<8x128xf32>,
    %31 = vector.extract_strided_slice %1 {offsets = [0, 18], sizes = [8, 110], strides = [1, 1]} : vector<8x128xf32> to vector<8x110xf32>
    %cst_18 = arith.constant 0.000000e+00 : f32
    %32 = vector.broadcast %cst_18 : f32 to vector<8x18xf32>
    %33 = tpu.concatenate %31, %32 in 1 : vector<8x110xf32>, vector<8x18xf32> -> vector<8x128xf32>
    %c224 = arith.constant 224 : index
    %c0_19 = arith.constant 0 : index
    %34 = vector.load %arg7[%c224, %c0_19] : memref<288x128xf32, #tpu.memory_space<vmem>>, vector<8x128xf32>
    tpu.vector_store %arg7[%c224, %c0_19], %33 {strides = array<i32>} : memref<288x128xf32, #tpu.memory_space<vmem>>, vector<8x128xf32>,
    %c0_20 = arith.constant 0 : index
    %c1 = arith.constant 1 : index
    %c0_21 = arith.constant 0 : index
    %c0_22 = arith.constant 0 : index
    %35 = vector.load %arg1[%c0_20, %c1, %c0_21, %c0_22] : memref<2x2x8x128xf32, #tpu.memory_space<vmem>>, vector<1x1x8x128xf32>
    %36 = vector.shape_cast %35 : vector<1x1x8x128xf32> to vector<8x128xf32>
    %c8 = arith.constant 8 : index
    %c0_23 = arith.constant 0 : index
    %37 = vector.load %arg7[%c8, %c0_23] : memref<288x128xf32, #tpu.memory_space<vmem>>, vector<8x128xf32>
    tpu.vector_store %arg7[%c8, %c0_23], %36 {strides = array<i32>} : memref<288x128xf32, #tpu.memory_space<vmem>>, vector<8x128xf32>,
    %38 = vector.extract_strided_slice %36 {offsets = [0, 1], sizes = [8, 127], strides = [1, 1]} : vector<8x128xf32> to vector<8x127xf32>
    %cst_24 = arith.constant 0.000000e+00 : f32
    %39 = vector.broadcast %cst_24 : f32 to vector<8x1xf32>
    %40 = tpu.concatenate %38, %39 in 1 : vector<8x127xf32>, vector<8x1xf32> -> vector<8x128xf32>
    %c24 = arith.constant 24 : index
    %c0_25 = arith.constant 0 : index
    %41 = vector.load %arg7[%c24, %c0_25] : memref<288x128xf32, #tpu.memory_space<vmem>>, vector<8x128xf32>
    tpu.vector_store %arg7[%c24, %c0_25], %40 {strides = array<i32>} : memref<288x128xf32, #tpu.memory_space<vmem>>, vector<8x128xf32>,
    %42 = vector.extract_strided_slice %36 {offsets = [0, 2], sizes = [8, 126], strides = [1, 1]} : vector<8x128xf32> to vector<8x126xf32>
    %cst_26 = arith.constant 0.000000e+00 : f32
    %43 = vector.broadcast %cst_26 : f32 to vector<8x2xf32>
    %44 = tpu.concatenate %42, %43 in 1 : vector<8x126xf32>, vector<8x2xf32> -> vector<8x128xf32>
    %c40 = arith.constant 40 : index
    %c0_27 = arith.constant 0 : index
    %45 = vector.load %arg7[%c40, %c0_27] : memref<288x128xf32, #tpu.memory_space<vmem>>, vector<8x128xf32>
    tpu.vector_store %arg7[%c40, %c0_27], %44 {strides = array<i32>} : memref<288x128xf32, #tpu.memory_space<vmem>>, vector<8x128xf32>,
    %46 = vector.extract_strided_slice %36 {offsets = [0, 8], sizes = [8, 120], strides = [1, 1]} : vector<8x128xf32> to vector<8x120xf32>
    %cst_28 = arith.constant 0.000000e+00 : f32
    %47 = vector.broadcast %cst_28 : f32 to vector<8x8xf32>
    %48 = tpu.concatenate %46, %47 in 1 : vector<8x120xf32>, vector<8x8xf32> -> vector<8x128xf32>
    %c104 = arith.constant 104 : index
    %c0_29 = arith.constant 0 : index
    %49 = vector.load %arg7[%c104, %c0_29] : memref<288x128xf32, #tpu.memory_space<vmem>>, vector<8x128xf32>
    tpu.vector_store %arg7[%c104, %c0_29], %48 {strides = array<i32>} : memref<288x128xf32, #tpu.memory_space<vmem>>, vector<8x128xf32>,
    %50 = vector.extract_strided_slice %36 {offsets = [0, 9], sizes = [8, 119], strides = [1, 1]} : vector<8x128xf32> to vector<8x119xf32>
    %cst_30 = arith.constant 0.000000e+00 : f32
    %51 = vector.broadcast %cst_30 : f32 to vector<8x9xf32>
    %52 = tpu.concatenate %50, %51 in 1 : vector<8x119xf32>, vector<8x9xf32> -> vector<8x128xf32>
    %c120 = arith.constant 120 : index
    %c0_31 = arith.constant 0 : index
    %53 = vector.load %arg7[%c120, %c0_31] : memref<288x128xf32, #tpu.memory_space<vmem>>, vector<8x128xf32>
    tpu.vector_store %arg7[%c120, %c0_31], %52 {strides = array<i32>} : memref<288x128xf32, #tpu.memory_space<vmem>>, vector<8x128xf32>,
    %54 = vector.extract_strided_slice %36 {offsets = [0, 10], sizes = [8, 118], strides = [1, 1]} : vector<8x128xf32> to vector<8x118xf32>
    %cst_32 = arith.constant 0.000000e+00 : f32
    %55 = vector.broadcast %cst_32 : f32 to vector<8x10xf32>
    %56 = tpu.concatenate %54, %55 in 1 : vector<8x118xf32>, vector<8x10xf32> -> vector<8x128xf32>
    %c136 = arith.constant 136 : index
    %c0_33 = arith.constant 0 : index
    %57 = vector.load %arg7[%c136, %c0_33] : memref<288x128xf32, #tpu.memory_space<vmem>>, vector<8x128xf32>
    tpu.vector_store %arg7[%c136, %c0_33], %56 {strides = array<i32>} : memref<288x128xf32, #tpu.memory_space<vmem>>, vector<8x128xf32>,
    %58 = vector.extract_strided_slice %36 {offsets = [0, 16], sizes = [8, 112], strides = [1, 1]} : vector<8x128xf32> to vector<8x112xf32>
    %cst_34 = arith.constant 0.000000e+00 : f32
    %59 = vector.broadcast %cst_34 : f32 to vector<8x16xf32>
    %60 = tpu.concatenate %58, %59 in 1 : vector<8x112xf32>, vector<8x16xf32> -> vector<8x128xf32>
    %c200 = arith.constant 200 : index
    %c0_35 = arith.constant 0 : index
    %61 = vector.load %arg7[%c200, %c0_35] : memref<288x128xf32, #tpu.memory_space<vmem>>, vector<8x128xf32>
    tpu.vector_store %arg7[%c200, %c0_35], %60 {strides = array<i32>} : memref<288x128xf32, #tpu.memory_space<vmem>>, vector<8x128xf32>,
    %62 = vector.extract_strided_slice %36 {offsets = [0, 17], sizes = [8, 111], strides = [1, 1]} : vector<8x128xf32> to vector<8x111xf32>
    %cst_36 = arith.constant 0.000000e+00 : f32
    %63 = vector.broadcast %cst_36 : f32 to vector<8x17xf32>
    %64 = tpu.concatenate %62, %63 in 1 : vector<8x111xf32>, vector<8x17xf32> -> vector<8x128xf32>
    %c216 = arith.constant 216 : index
    %c0_37 = arith.constant 0 : index
    %65 = vector.load %arg7[%c216, %c0_37] : memref<288x128xf32, #tpu.memory_space<vmem>>, vector<8x128xf32>
    tpu.vector_store %arg7[%c216, %c0_37], %64 {strides = array<i32>} : memref<288x128xf32, #tpu.memory_space<vmem>>, vector<8x128xf32>,
    %66 = vector.extract_strided_slice %36 {offsets = [0, 18], sizes = [8, 110], strides = [1, 1]} : vector<8x128xf32> to vector<8x110xf32>
    %cst_38 = arith.constant 0.000000e+00 : f32
    %67 = vector.broadcast %cst_38 : f32 to vector<8x18xf32>
    %68 = tpu.concatenate %66, %67 in 1 : vector<8x110xf32>, vector<8x18xf32> -> vector<8x128xf32>
    %c232 = arith.constant 232 : index
    %c0_39 = arith.constant 0 : index
    %69 = vector.load %arg7[%c232, %c0_39] : memref<288x128xf32, #tpu.memory_space<vmem>>, vector<8x128xf32>
    tpu.vector_store %arg7[%c232, %c0_39], %68 {strides = array<i32>} : memref<288x128xf32, #tpu.memory_space<vmem>>, vector<8x128xf32>,
    %c1_40 = arith.constant 1 : index
    %c0_41 = arith.constant 0 : index
    %c0_42 = arith.constant 0 : index
    %c0_43 = arith.constant 0 : index
    %70 = vector.load %arg1[%c1_40, %c0_41, %c0_42, %c0_43] : memref<2x2x8x128xf32, #tpu.memory_space<vmem>>, vector<1x1x8x128xf32>
    %71 = vector.shape_cast %70 : vector<1x1x8x128xf32> to vector<8x128xf32>
    %c48 = arith.constant 48 : index
    %c0_44 = arith.constant 0 : index
    %72 = vector.load %arg7[%c48, %c0_44] : memref<288x128xf32, #tpu.memory_space<vmem>>, vector<8x128xf32>
    tpu.vector_store %arg7[%c48, %c0_44], %71 {strides = array<i32>} : memref<288x128xf32, #tpu.memory_space<vmem>>, vector<8x128xf32>,
    %73 = vector.extract_strided_slice %71 {offsets = [0, 1], sizes = [8, 127], strides = [1, 1]} : vector<8x128xf32> to vector<8x127xf32>
    %cst_45 = arith.constant 0.000000e+00 : f32
    %74 = vector.broadcast %cst_45 : f32 to vector<8x1xf32>
    %75 = tpu.concatenate %73, %74 in 1 : vector<8x127xf32>, vector<8x1xf32> -> vector<8x128xf32>
    %c64 = arith.constant 64 : index
    %c0_46 = arith.constant 0 : index
    %76 = vector.load %arg7[%c64, %c0_46] : memref<288x128xf32, #tpu.memory_space<vmem>>, vector<8x128xf32>
    tpu.vector_store %arg7[%c64, %c0_46], %75 {strides = array<i32>} : memref<288x128xf32, #tpu.memory_space<vmem>>, vector<8x128xf32>,
    %77 = vector.extract_strided_slice %71 {offsets = [0, 2], sizes = [8, 126], strides = [1, 1]} : vector<8x128xf32> to vector<8x126xf32>
    %cst_47 = arith.constant 0.000000e+00 : f32
    %78 = vector.broadcast %cst_47 : f32 to vector<8x2xf32>
    %79 = tpu.concatenate %77, %78 in 1 : vector<8x126xf32>, vector<8x2xf32> -> vector<8x128xf32>
    %c80 = arith.constant 80 : index
    %c0_48 = arith.constant 0 : index
    %80 = vector.load %arg7[%c80, %c0_48] : memref<288x128xf32, #tpu.memory_space<vmem>>, vector<8x128xf32>
    tpu.vector_store %arg7[%c80, %c0_48], %79 {strides = array<i32>} : memref<288x128xf32, #tpu.memory_space<vmem>>, vector<8x128xf32>,
    %81 = vector.extract_strided_slice %71 {offsets = [0, 8], sizes = [8, 120], strides = [1, 1]} : vector<8x128xf32> to vector<8x120xf32>
    %cst_49 = arith.constant 0.000000e+00 : f32
    %82 = vector.broadcast %cst_49 : f32 to vector<8x8xf32>
    %83 = tpu.concatenate %81, %82 in 1 : vector<8x120xf32>, vector<8x8xf32> -> vector<8x128xf32>
    %c144 = arith.constant 144 : index
    %c0_50 = arith.constant 0 : index
    %84 = vector.load %arg7[%c144, %c0_50] : memref<288x128xf32, #tpu.memory_space<vmem>>, vector<8x128xf32>
    tpu.vector_store %arg7[%c144, %c0_50], %83 {strides = array<i32>} : memref<288x128xf32, #tpu.memory_space<vmem>>, vector<8x128xf32>,
    %85 = vector.extract_strided_slice %71 {offsets = [0, 9], sizes = [8, 119], strides = [1, 1]} : vector<8x128xf32> to vector<8x119xf32>
    %cst_51 = arith.constant 0.000000e+00 : f32
    %86 = vector.broadcast %cst_51 : f32 to vector<8x9xf32>
    %87 = tpu.concatenate %85, %86 in 1 : vector<8x119xf32>, vector<8x9xf32> -> vector<8x128xf32>
    %c160 = arith.constant 160 : index
    %c0_52 = arith.constant 0 : index
    %88 = vector.load %arg7[%c160, %c0_52] : memref<288x128xf32, #tpu.memory_space<vmem>>, vector<8x128xf32>
    tpu.vector_store %arg7[%c160, %c0_52], %87 {strides = array<i32>} : memref<288x128xf32, #tpu.memory_space<vmem>>, vector<8x128xf32>,
    %89 = vector.extract_strided_slice %71 {offsets = [0, 10], sizes = [8, 118], strides = [1, 1]} : vector<8x128xf32> to vector<8x118xf32>
    %cst_53 = arith.constant 0.000000e+00 : f32
    %90 = vector.broadcast %cst_53 : f32 to vector<8x10xf32>
    %91 = tpu.concatenate %89, %90 in 1 : vector<8x118xf32>, vector<8x10xf32> -> vector<8x128xf32>
    %c176 = arith.constant 176 : index
    %c0_54 = arith.constant 0 : index
    %92 = vector.load %arg7[%c176, %c0_54] : memref<288x128xf32, #tpu.memory_space<vmem>>, vector<8x128xf32>
    tpu.vector_store %arg7[%c176, %c0_54], %91 {strides = array<i32>} : memref<288x128xf32, #tpu.memory_space<vmem>>, vector<8x128xf32>,
    %93 = vector.extract_strided_slice %71 {offsets = [0, 16], sizes = [8, 112], strides = [1, 1]} : vector<8x128xf32> to vector<8x112xf32>
    %cst_55 = arith.constant 0.000000e+00 : f32
    %94 = vector.broadcast %cst_55 : f32 to vector<8x16xf32>
    %95 = tpu.concatenate %93, %94 in 1 : vector<8x112xf32>, vector<8x16xf32> -> vector<8x128xf32>
    %c240 = arith.constant 240 : index
    %c0_56 = arith.constant 0 : index
    %96 = vector.load %arg7[%c240, %c0_56] : memref<288x128xf32, #tpu.memory_space<vmem>>, vector<8x128xf32>
    tpu.vector_store %arg7[%c240, %c0_56], %95 {strides = array<i32>} : memref<288x128xf32, #tpu.memory_space<vmem>>, vector<8x128xf32>,
    %97 = vector.extract_strided_slice %71 {offsets = [0, 17], sizes = [8, 111], strides = [1, 1]} : vector<8x128xf32> to vector<8x111xf32>
    %cst_57 = arith.constant 0.000000e+00 : f32
    %98 = vector.broadcast %cst_57 : f32 to vector<8x17xf32>
    %99 = tpu.concatenate %97, %98 in 1 : vector<8x111xf32>, vector<8x17xf32> -> vector<8x128xf32>
    %c256 = arith.constant 256 : index
    %c0_58 = arith.constant 0 : index
    %100 = vector.load %arg7[%c256, %c0_58] : memref<288x128xf32, #tpu.memory_space<vmem>>, vector<8x128xf32>
    tpu.vector_store %arg7[%c256, %c0_58], %99 {strides = array<i32>} : memref<288x128xf32, #tpu.memory_space<vmem>>, vector<8x128xf32>,
    %101 = vector.extract_strided_slice %71 {offsets = [0, 18], sizes = [8, 110], strides = [1, 1]} : vector<8x128xf32> to vector<8x110xf32>
    %cst_59 = arith.constant 0.000000e+00 : f32
    %102 = vector.broadcast %cst_59 : f32 to vector<8x18xf32>
    %103 = tpu.concatenate %101, %102 in 1 : vector<8x110xf32>, vector<8x18xf32> -> vector<8x128xf32>
    %c272 = arith.constant 272 : index
    %c0_60 = arith.constant 0 : index
    %104 = vector.load %arg7[%c272, %c0_60] : memref<288x128xf32, #tpu.memory_space<vmem>>, vector<8x128xf32>
    tpu.vector_store %arg7[%c272, %c0_60], %103 {strides = array<i32>} : memref<288x128xf32, #tpu.memory_space<vmem>>, vector<8x128xf32>,
    %c1_61 = arith.constant 1 : index
    %c1_62 = arith.constant 1 : index
    %c0_63 = arith.constant 0 : index
    %c0_64 = arith.constant 0 : index
    %105 = vector.load %arg1[%c1_61, %c1_62, %c0_63, %c0_64] : memref<2x2x8x128xf32, #tpu.memory_space<vmem>>, vector<1x1x8x128xf32>
    %106 = vector.shape_cast %105 : vector<1x1x8x128xf32> to vector<8x128xf32>
    %c56 = arith.constant 56 : index
    %c0_65 = arith.constant 0 : index
    %107 = vector.load %arg7[%c56, %c0_65] : memref<288x128xf32, #tpu.memory_space<vmem>>, vector<8x128xf32>
    tpu.vector_store %arg7[%c56, %c0_65], %106 {strides = array<i32>} : memref<288x128xf32, #tpu.memory_space<vmem>>, vector<8x128xf32>,
    %108 = vector.extract_strided_slice %106 {offsets = [0, 1], sizes = [8, 127], strides = [1, 1]} : vector<8x128xf32> to vector<8x127xf32>
    %cst_66 = arith.constant 0.000000e+00 : f32
    %109 = vector.broadcast %cst_66 : f32 to vector<8x1xf32>
    %110 = tpu.concatenate %108, %109 in 1 : vector<8x127xf32>, vector<8x1xf32> -> vector<8x128xf32>
    %c72 = arith.constant 72 : index
    %c0_67 = arith.constant 0 : index
    %111 = vector.load %arg7[%c72, %c0_67] : memref<288x128xf32, #tpu.memory_space<vmem>>, vector<8x128xf32>
    tpu.vector_store %arg7[%c72, %c0_67], %110 {strides = array<i32>} : memref<288x128xf32, #tpu.memory_space<vmem>>, vector<8x128xf32>,
    %112 = vector.extract_strided_slice %106 {offsets = [0, 2], sizes = [8, 126], strides = [1, 1]} : vector<8x128xf32> to vector<8x126xf32>
    %cst_68 = arith.constant 0.000000e+00 : f32
    %113 = vector.broadcast %cst_68 : f32 to vector<8x2xf32>
    %114 = tpu.concatenate %112, %113 in 1 : vector<8x126xf32>, vector<8x2xf32> -> vector<8x128xf32>
    %c88 = arith.constant 88 : index
    %c0_69 = arith.constant 0 : index
    %115 = vector.load %arg7[%c88, %c0_69] : memref<288x128xf32, #tpu.memory_space<vmem>>, vector<8x128xf32>
    tpu.vector_store %arg7[%c88, %c0_69], %114 {strides = array<i32>} : memref<288x128xf32, #tpu.memory_space<vmem>>, vector<8x128xf32>,
    %116 = vector.extract_strided_slice %106 {offsets = [0, 8], sizes = [8, 120], strides = [1, 1]} : vector<8x128xf32> to vector<8x120xf32>
    %cst_70 = arith.constant 0.000000e+00 : f32
    %117 = vector.broadcast %cst_70 : f32 to vector<8x8xf32>
    %118 = tpu.concatenate %116, %117 in 1 : vector<8x120xf32>, vector<8x8xf32> -> vector<8x128xf32>
    %c152 = arith.constant 152 : index
    %c0_71 = arith.constant 0 : index
    %119 = vector.load %arg7[%c152, %c0_71] : memref<288x128xf32, #tpu.memory_space<vmem>>, vector<8x128xf32>
    tpu.vector_store %arg7[%c152, %c0_71], %118 {strides = array<i32>} : memref<288x128xf32, #tpu.memory_space<vmem>>, vector<8x128xf32>,
    %120 = vector.extract_strided_slice %106 {offsets = [0, 9], sizes = [8, 119], strides = [1, 1]} : vector<8x128xf32> to vector<8x119xf32>
    %cst_72 = arith.constant 0.000000e+00 : f32
    %121 = vector.broadcast %cst_72 : f32 to vector<8x9xf32>
    %122 = tpu.concatenate %120, %121 in 1 : vector<8x119xf32>, vector<8x9xf32> -> vector<8x128xf32>
    %c168 = arith.constant 168 : index
    %c0_73 = arith.constant 0 : index
    %123 = vector.load %arg7[%c168, %c0_73] : memref<288x128xf32, #tpu.memory_space<vmem>>, vector<8x128xf32>
    tpu.vector_store %arg7[%c168, %c0_73], %122 {strides = array<i32>} : memref<288x128xf32, #tpu.memory_space<vmem>>, vector<8x128xf32>,
    %124 = vector.extract_strided_slice %106 {offsets = [0, 10], sizes = [8, 118], strides = [1, 1]} : vector<8x128xf32> to vector<8x118xf32>
    %cst_74 = arith.constant 0.000000e+00 : f32
    %125 = vector.broadcast %cst_74 : f32 to vector<8x10xf32>
    %126 = tpu.concatenate %124, %125 in 1 : vector<8x118xf32>, vector<8x10xf32> -> vector<8x128xf32>
    %c184 = arith.constant 184 : index
    %c0_75 = arith.constant 0 : index
    %127 = vector.load %arg7[%c184, %c0_75] : memref<288x128xf32, #tpu.memory_space<vmem>>, vector<8x128xf32>
    tpu.vector_store %arg7[%c184, %c0_75], %126 {strides = array<i32>} : memref<288x128xf32, #tpu.memory_space<vmem>>, vector<8x128xf32>,
    %128 = vector.extract_strided_slice %106 {offsets = [0, 16], sizes = [8, 112], strides = [1, 1]} : vector<8x128xf32> to vector<8x112xf32>
    %cst_76 = arith.constant 0.000000e+00 : f32
    %129 = vector.broadcast %cst_76 : f32 to vector<8x16xf32>
    %130 = tpu.concatenate %128, %129 in 1 : vector<8x112xf32>, vector<8x16xf32> -> vector<8x128xf32>
    %c248 = arith.constant 248 : index
    %c0_77 = arith.constant 0 : index
    %131 = vector.load %arg7[%c248, %c0_77] : memref<288x128xf32, #tpu.memory_space<vmem>>, vector<8x128xf32>
    tpu.vector_store %arg7[%c248, %c0_77], %130 {strides = array<i32>} : memref<288x128xf32, #tpu.memory_space<vmem>>, vector<8x128xf32>,
    %132 = vector.extract_strided_slice %106 {offsets = [0, 17], sizes = [8, 111], strides = [1, 1]} : vector<8x128xf32> to vector<8x111xf32>
    %cst_78 = arith.constant 0.000000e+00 : f32
    %133 = vector.broadcast %cst_78 : f32 to vector<8x17xf32>
    %134 = tpu.concatenate %132, %133 in 1 : vector<8x111xf32>, vector<8x17xf32> -> vector<8x128xf32>
    %c264 = arith.constant 264 : index
    %c0_79 = arith.constant 0 : index
    %135 = vector.load %arg7[%c264, %c0_79] : memref<288x128xf32, #tpu.memory_space<vmem>>, vector<8x128xf32>
    tpu.vector_store %arg7[%c264, %c0_79], %134 {strides = array<i32>} : memref<288x128xf32, #tpu.memory_space<vmem>>, vector<8x128xf32>,
    %136 = vector.extract_strided_slice %106 {offsets = [0, 18], sizes = [8, 110], strides = [1, 1]} : vector<8x128xf32> to vector<8x110xf32>
    %cst_80 = arith.constant 0.000000e+00 : f32
    %137 = vector.broadcast %cst_80 : f32 to vector<8x18xf32>
    %138 = tpu.concatenate %136, %137 in 1 : vector<8x110xf32>, vector<8x18xf32> -> vector<8x128xf32>
    %c280 = arith.constant 280 : index
    %c0_81 = arith.constant 0 : index
    %139 = vector.load %arg7[%c280, %c0_81] : memref<288x128xf32, #tpu.memory_space<vmem>>, vector<8x128xf32>
    tpu.vector_store %arg7[%c280, %c0_81], %138 {strides = array<i32>} : memref<288x128xf32, #tpu.memory_space<vmem>>, vector<8x128xf32>,
    %c0_82 = arith.constant 0 : index
    %c0_83 = arith.constant 0 : index
    %140 = vector.load %arg2[%c0_82, %c0_83] : memref<32x288xf32, #tpu.memory_space<vmem>>, vector<32x288xf32>
    %c0_84 = arith.constant 0 : index
    %c0_85 = arith.constant 0 : index
    %141 = vector.load %arg7[%c0_84, %c0_85] : memref<288x128xf32, #tpu.memory_space<vmem>>, vector<288x128xf32>
    %cst_86 = arith.constant dense<0.000000e+00> : vector<32x128xf32>
    %142 = tpu.matmul %140, %141, %cst_86 {dimension_numbers = #tpu.dot_dimension_numbers<[1], [0], [0], [1], [0, 0, 1, 1], [], []>} : vector<32x288xf32>, vector<288x128xf32>, vector<32x128xf32> -> vector<32x128xf32>
    %c0_87 = arith.constant 0 : index
    %c0_88 = arith.constant 0 : index
    %143 = vector.load %arg3[%c0_87, %c0_88] : memref<32x1xf32, #tpu.memory_space<vmem>>, vector<32x1xf32>
    %144 = vector.broadcast %143 : vector<32x1xf32> to vector<32x128xf32>
    %145 = arith.addf %142, %144 : vector<32x128xf32>
    %cst_89 = arith.constant 0.000000e+00 : f32
    %146 = vector.broadcast %cst_89 : f32 to vector<32x128xf32>
    %147 = arith.maximumf %145, %146 : vector<32x128xf32>
    %148 = vector.extract_strided_slice %147 {offsets = [0, 0], sizes = [8, 128], strides = [1, 1]} : vector<32x128xf32> to vector<8x128xf32>
    %c0_i32 = arith.constant 0 : i32
    %149 = vector.broadcast %c0_i32 : i32 to vector<8x128xi32>
    %150 = vector.extract_strided_slice %147 {offsets = [8, 0], sizes = [8, 128], strides = [1, 1]} : vector<32x128xf32> to vector<8x128xf32>
    %151 = arith.cmpf ogt, %150, %148 : vector<8x128xf32>
    %152 = arith.select %151, %150, %148 : vector<8x128xi1>, vector<8x128xf32>
    %c1_i32 = arith.constant 1 : i32
    %153 = vector.broadcast %c1_i32 : i32 to vector<8x128xi32>
    %154 = arith.select %151, %153, %149 : vector<8x128xi1>, vector<8x128xi32>
    %155 = vector.extract_strided_slice %147 {offsets = [16, 0], sizes = [8, 128], strides = [1, 1]} : vector<32x128xf32> to vector<8x128xf32>
    %156 = arith.cmpf ogt, %155, %152 : vector<8x128xf32>
    %157 = arith.select %156, %155, %152 : vector<8x128xi1>, vector<8x128xf32>
    %c12_i32 = arith.constant 12 : i32
    %158 = vector.broadcast %c12_i32 : i32 to vector<8x128xi32>
    %159 = arith.select %156, %158, %154 : vector<8x128xi1>, vector<8x128xi32>
    %160 = vector.extract_strided_slice %147 {offsets = [24, 0], sizes = [8, 128], strides = [1, 1]} : vector<32x128xf32> to vector<8x128xf32>
    %161 = arith.cmpf ogt, %160, %157 : vector<8x128xf32>
    %162 = arith.select %161, %160, %157 : vector<8x128xi1>, vector<8x128xf32>
    %c13_i32 = arith.constant 13 : i32
    %163 = vector.broadcast %c13_i32 : i32 to vector<8x128xi32>
    %164 = arith.select %161, %163, %159 : vector<8x128xi1>, vector<8x128xi32>
    %c0_90 = arith.constant 0 : index
    %c0_91 = arith.constant 0 : index
    %165 = vector.load %arg5[%c0_90, %c0_91] : memref<8x128xf32, #tpu.memory_space<vmem>>, vector<8x128xf32>
    tpu.vector_store %arg5[%c0_90, %c0_91], %162 {strides = array<i32>} : memref<8x128xf32, #tpu.memory_space<vmem>>, vector<8x128xf32>,
    %c0_92 = arith.constant 0 : index
    %c0_93 = arith.constant 0 : index
    %166 = vector.load %arg4[%c0_92, %c0_93] : memref<1x128xi32, #tpu.memory_space<vmem>>, vector<1x128xi32>
    %167 = vector.broadcast %166 : vector<1x128xi32> to vector<8x128xi32>
    %168 = arith.addi %167, %164 : vector<8x128xi32>
    %c0_94 = arith.constant 0 : index
    %c0_95 = arith.constant 0 : index
    %169 = vector.load %arg6[%c0_94, %c0_95] : memref<8x128xi32, #tpu.memory_space<vmem>>, vector<8x128xi32>
    tpu.vector_store %arg6[%c0_94, %c0_95], %168 {strides = array<i32>} : memref<8x128xi32, #tpu.memory_space<vmem>>, vector<8x128xi32>,
    return
  }
  func.func @transform_0(%arg0: i32) -> (i32, i32, i32, i32) {
    %c0_i32 = arith.constant 0 : i32
    %c0_i32_0 = arith.constant 0 : i32
    %c0_i32_1 = arith.constant 0 : i32
    %c0_i32_2 = arith.constant 0 : i32
    return %c0_i32, %c0_i32_0, %c0_i32_1, %arg0 : i32, i32, i32, i32
  }
  func.func @transform_1(%arg0: i32) -> (i32, i32) {
    %c0_i32 = arith.constant 0 : i32
    %c0_i32_0 = arith.constant 0 : i32
    %c0_i32_1 = arith.constant 0 : i32
    return %c0_i32, %c0_i32_0 : i32, i32
  }
  func.func @transform_2(%arg0: i32) -> (i32, i32) {
    %c0_i32 = arith.constant 0 : i32
    %c0_i32_0 = arith.constant 0 : i32
    %c0_i32_1 = arith.constant 0 : i32
    return %c0_i32, %c0_i32_0 : i32, i32
  }
  func.func @transform_3(%arg0: i32) -> (i32, i32) {
    %c0_i32 = arith.constant 0 : i32
    %c0_i32_0 = arith.constant 0 : i32
    return %c0_i32, %arg0 : i32, i32
  }
  func.func @transform_4(%arg0: i32) -> (i32, i32) {
    %c0_i32 = arith.constant 0 : i32
    %c0_i32_0 = arith.constant 0 : i32
    return %c0_i32, %arg0 : i32, i32
  }
  func.func @transform_5(%arg0: i32) -> (i32, i32) {
    %c0_i32 = arith.constant 0 : i32
    %c0_i32_0 = arith.constant 0 : i32
    return %c0_i32, %arg0 : i32, i32
  }
}

</mosaic_0001>

<bundles_post_ra>
// kernel: tpu_custom_call.1
= control target key start
LH: loop header
LB: loop body
LE: loop exit
PB: predicated region body
PF: predicated region fallthrough
CT: control target
= control target key end

     0   :  { %11 = vsyncpa [#allocation4], 0  ;;  %s886_s0 = inlined_call_operand.vmem [shape: f32[2,2,8,128], index: 0, kind: input, shape index: {}]   ;;  %s887_s1 = inlined_call_operand.hbm [shape: f32[32,288], index: 1, kind: input, shape index: {}]   ;;  %s888_s2 = inlined_call_operand.vmem [shape: f32[32,1], index: 2, kind: input, shape index: {}]   ;;  %s889_s3 = inlined_call_operand.vmem [shape: s32[1,128], index: 3, kind: input, shape index: {}]   ;;  %s890_s4 = inlined_call_operand.hbm [shape: f32[8,128], index: 4, kind: output, shape index: {0}]   ;;  %s891_s5 = inlined_call_operand.hbm [shape: s32[8,128], index: 5, kind: output, shape index: {1}]  }
   0x1   :  { %12 = vsyncpa [#allocation5], 0 }
   0x2   :  { %13 = vsyncpa [#allocation8], 0  ;;  %s711_s18 = smov [#allocation3]  }
   0x3   :  { %s21_s19 = sshll.u32 %s711_s18, 4  ;;  %s22_s19 = int_to_ptr.vmem [resolvable:$true] %s21_s19 }
   0x4   :  { %s653_s20 = scalar_lea.vmem %s22_s19, 1536  ;;  %p658_p1 = scmp.lt.s32.totalorder %s22_s19, %s22_s19 }
   0x5   :  { %p654_p0 = scmp.ne.s32.totalorder %s22_s19, %s653_s20  ;;  %p659_p2 = scmp.lt.s32.totalorder %s653_s20, %s653_s20 }
   0x7   :  { %p660_p3 = por %p659_p2, %p658_p1 }
   0x9   :  { %p661_p4 = pnand %p660_p3, %p654_p0 }
   0xb   :  { %664 = shalt.err (!%p661_p4)
}
   0xc   :  { %s712_s21 = smov 384   ;;  %s713_s22 = smov 24  }
   0xd   :  { %27 = dma.hbm_to_vmem [thread:$0]  %s887_s1, 1536, %s22_s19, [#allocation4], %s712_s21, %s712_s21, %s713_s22  }
   0xe   :  { %705 = dma.done.wait [#allocation4], 1536  }
   0xf   :  { %706 = vsyncadd [#allocation4], 4294965760  ;;  %v761_v0 = vld [vmem:[%s886_s0 + $0x18] sm:$0xff]  ;;  %v766_v1 = vld [vmem:[%s886_s0 + $0x10] sm:$0xff]  ;;  %s714_s29 = smov 112   ;;  %s715_s8 = smov 119  }
  0x10   :  { %203 = vrot.lane.b32.xlu0 %v761_v0, %s714_s29  ;;  %159 = vrot.lane.b32.xlu1 %v766_v1, %s714_s29  ;;  %v773_v2 = vld [vmem:[%s886_s0 + $0x8] sm:$0xff]  ;;  %v778_v3 = vld [vmem:[%s886_s0] sm:$0xff]  ;;  %s716_s9 = smov 110   ;;  %s717_s10 = smov 120   ;;  %v220_v5 = vld [vmem:[#allocation3 + $0x10] sm:$0xff]  ;;  %vm290_vm0 = vcmask 261120  }
  0x11   :  { %s718_s11 = smov 111   ;;  %s719_s0 = smov 126   ;;  %v219_v4 = vld [vmem:[#allocation3 + $0x8] sm:$0xff]  ;;  %623 = vmatprep.mubr.msk.f32.mxu1 %vm290_vm0, %v220_v5  ;;  %v722_v6 = vmov 0   ;;  %v266_v7 = vld [vmem:[%s888_s2] sm:$0xff]  ;;  %v268_v9 = vld [vmem:[%s888_s2 + $0x10] sm:$0xff] }
  0x12   :  { %s720_s12 = smov 127   ;;  %s721_s13 = smov 118   ;;  %367 = vmatprep.mubr.f32.mxu0 %v219_v4  ;;  %643 = vset.pattern.permute.xlu0 %v722_v6  ;;  %v267_v8 = vld [vmem:[%s888_s2 + $0x8] sm:$0xff]  ;;  %v269_v10 = vld [vmem:[%s888_s2 + $0x18] sm:$0xff]  ;;  %vm71_vm1 = vcmask 916480   ;;  %vm59_vm2 = vcmask 973824  }
  0x13   :  { %644 = vset.pattern.permute.xlu1 %v722_v6  ;;  %vm83_vm3 = vcmask 900096   ;;  %vm53_vm4 = vcmask 982016   ;;  %vm77_vm5 = vcmask 908288   ;;  %vm47_vm6 = vcmask 1031168   ;;  %v218_v39 = vld [vmem:[#allocation3] sm:$0xff]  ;;  %v221_v43 = vld [vmem:[#allocation3 + $0x18] sm:$0xff] }
  0x14   :  { %105 = vrot.lane.b32.xlu0 %v773_v2, %s715_s8  ;;  %56 = vrot.lane.b32.xlu1 %v778_v3, %s715_s8  ;;  %vm41_vm7 = vcmask 1039360   ;;  %vm65_vm8 = vcmask 965632   ;;  %v222_v40 = vld [vmem:[#allocation3 + $0x20] sm:$0xff]  ;;  %v225_v44 = vld [vmem:[#allocation3 + $0x38] sm:$0xff]  ;;  %v224_v47 = vld [vmem:[#allocation3 + $0x30] sm:$0xff]  ;;  %s723_s2 = smov [#allocation6]  }
  0x15   :  { %v223_v48 = vld [vmem:[#allocation3 + $0x28] sm:$0xff]  ;;  %v228_v49 = vld [vmem:[#allocation3 + $0x50] sm:$0xff]  ;;  %v226_v50 = vld [vmem:[#allocation3 + $0x40] sm:$0xff]  ;;  %s500_s22 = sshll.u32 %s723_s2, 4  ;;  %s724_s25 = smov [#allocation7]   ;;  %s501_s22 = int_to_ptr.vmem [resolvable:$true] %s500_s22 }
  0x16   :  { %v227_v51 = vld [vmem:[#allocation3 + $0x48] sm:$0xff]  ;;  %v229_v52 = vld [vmem:[#allocation3 + $0x58] sm:$0xff]  ;;  %s510_s26 = sshll.u32 %s724_s25, 4  ;;  %s665_s27 = scalar_lea.vmem %s501_s22, 128  ;;  %s511_s26 = int_to_ptr.vmem [resolvable:$true] %s510_s26 }
  0x17   :  { %p666_p5 = scmp.ne.s32.totalorder %s501_s22, %s665_s27  ;;  %p670_p6 = scmp.lt.s32.totalorder %s501_s22, %s501_s22 }
  0x18   :  { %125 = vrot.lane.b32.xlu0 %v773_v2, %s716_s9  ;;  %100 = vrot.lane.b32.xlu1 %v773_v2, %s717_s10  ;;  %p671_p7 = scmp.lt.s32.totalorder %s665_s27, %s665_s27 }
  0x1a   :  { %p672_p8 = por %p671_p7, %p670_p6 }
  0x1c   :  { %80 = vrot.lane.b32.xlu0 %v778_v3, %s716_s9  ;;  %50 = vrot.lane.b32.xlu1 %v778_v3, %s717_s10  ;;  %p673_p9 = pnand %p672_p8, %p666_p5 }
  0x20   :  { %120 = vrot.lane.b32.xlu0 %v773_v2, %s718_s11  ;;  %183 = vrot.lane.b32.xlu1 %v761_v0, %s719_s0 }
  0x24   :  { %74 = vrot.lane.b32.xlu0 %v778_v3, %s718_s11  ;;  %139 = vrot.lane.b32.xlu1 %v766_v1, %s719_s0 }
  0x28   :  { %115 = vrot.lane.b32.xlu0 %v773_v2, %s714_s29  ;;  %178 = vrot.lane.b32.xlu1 %v761_v0, %s720_s12 }
  0x2c   :  { %68 = vrot.lane.b32.xlu0 %v778_v3, %s714_s29  ;;  %134 = vrot.lane.b32.xlu1 %v766_v1, %s720_s12 }
  0x30   :  { %198 = vrot.lane.b32.xlu0 %v761_v0, %s721_s13  ;;  %154 = vrot.lane.b32.xlu1 %v766_v1, %s721_s13 }
  0x34   :  { %193 = vrot.lane.b32.xlu0 %v761_v0, %s715_s8  ;;  %95 = vrot.lane.b32.xlu1 %v773_v2, %s719_s0 }
  0x38   :  { %149 = vrot.lane.b32.xlu0 %v766_v1, %s715_s8  ;;  %44 = vrot.lane.b32.xlu1 %v778_v3, %s719_s0 }
  0x3c   :  { %188 = vrot.lane.b32.xlu0 %v761_v0, %s717_s10  ;;  %90 = vrot.lane.b32.xlu1 %v773_v2, %s720_s12 }
  0x40   :  { %144 = vrot.lane.b32.xlu0 %v766_v1, %s717_s10  ;;  %38 = vrot.lane.b32.xlu1 %v778_v3, %s720_s12 }
  0x44   :  { %110 = vrot.lane.b32.xlu0 %v773_v2, %s721_s13  ;;  %62 = vrot.lane.b32.xlu1 %v778_v3, %s721_s13 }
  0x48   :  { %213 = vrot.lane.b32.xlu0 %v761_v0, %s716_s9  ;;  %169 = vrot.lane.b32.xlu1 %v766_v1, %s716_s9 }
  0x4c   :  { %208 = vrot.lane.b32.xlu0 %v761_v0, %s718_s11  ;;  %164 = vrot.lane.b32.xlu1 %v766_v1, %s718_s11 }
  0x50   :  { %272 = vperm.xlu0 %643, %v266_v7   ;;  %277 = vperm.xlu1 %644, %v267_v8  }
  0x54   :  { %282 = vperm.xlu1 %644, %v268_v9   ;;  %287 = vperm.xlu0 %643, %v269_v10  }
  0x82   :  { %v204_v11 = vpop.permute.xlu0 %203  ;;  %v160_v12 = vpop.permute.xlu1 %159 }
  0x83   :  { %563 = vmatprep.subr.msk.mxu0 %vm71_vm1, %v204_v11 }
  0x86   :  { %v106_v13 = vpop.permute.xlu0 %105  ;;  %v57_v14 = vpop.permute.xlu1 %56 }
  0x87   :  { %564 = vmatpush3.msk.msra.mxu0 %vm59_vm2, %v106_v13 }
  0x88   :  { %565 = vmatprep.subr.msk.mxu0 %vm71_vm1, %v160_v12 }
  0x89   :  { %566 = vmatpush3.msk.msra.mxu0 %vm59_vm2, %v57_v14 }
  0x8a   :  { %v126_v15 = vpop.permute.xlu0 %125  ;;  %v101_v16 = vpop.permute.xlu1 %100 }
  0x8b   :  { %567 = vmatprep.subr.msk.mxu0 %vm83_vm3, %v126_v15 }
  0x8c   :  { %568 = vmatpush3.msk.msra.mxu0 %vm53_vm4, %v101_v16 }
  0x8e   :  { %v81_v17 = vpop.permute.xlu0 %80  ;;  %v51_v18 = vpop.permute.xlu1 %50 }
  0x8f   :  { %569 = vmatprep.subr.msk.mxu0 %vm83_vm3, %v81_v17 }
  0x90   :  { %570 = vmatpush3.msk.msra.mxu0 %vm53_vm4, %v51_v18 }
  0x92   :  { %v121_v19 = vpop.permute.xlu0 %120  ;;  %v184_v20 = vpop.permute.xlu1 %183 }
  0x93   :  { %571 = vmatprep.subr.msk.mxu0 %vm77_vm5, %v121_v19 }
  0x94   :  { %572 = vmatpush3.msk.msra.mxu0 %vm47_vm6, %v184_v20 }
  0x96   :  { %v75_v21 = vpop.permute.xlu0 %74  ;;  %v140_v22 = vpop.permute.xlu1 %139 }
  0x97   :  { %573 = vmatprep.subr.msk.mxu0 %vm77_vm5, %v75_v21 }
  0x98   :  { %574 = vmatpush3.msk.msra.mxu0 %vm47_vm6, %v140_v22 }
  0x9a   :  { %v116_v23 = vpop.permute.xlu0 %115  ;;  %v179_v24 = vpop.permute.xlu1 %178 }
  0x9b   :  { %575 = vmatprep.subr.msk.mxu0 %vm71_vm1, %v116_v23 }
  0x9c   :  { %576 = vmatpush3.msk.msra.mxu0 %vm41_vm7, %v179_v24 }
  0x9e   :  { %v69_v25 = vpop.permute.xlu0 %68  ;;  %v135_v26 = vpop.permute.xlu1 %134 }
  0x9f   :  { %577 = vmatprep.subr.msk.mxu0 %vm71_vm1, %v69_v25  ;;  %v530_v25 = vld [vmem:[%s889_s3] ss:$0 sm:$0xff] }
  0xa0   :  { %578 = vmatpush3.msk.msra.mxu0 %vm41_vm7, %v135_v26 }
  0xa2   :  { %v199_v27 = vpop.permute.xlu0 %198  ;;  %v155_v28 = vpop.permute.xlu1 %154 }
  0xa3   :  { %579 = vmatprep.subr.msk.mxu0 %vm65_vm8, %v199_v27 }
  0xa4   :  { %580 = vmatpush3.msra.mxu0 %v761_v0 }
  0xa5   :  { %581 = vmatprep.subr.msk.mxu0 %vm65_vm8, %v155_v28 }
  0xa6   :  { %v194_v29 = vpop.permute.xlu0 %193  ;;  %582 = vmatpush3.msra.mxu0 %v766_v1  ;;  %v96_v30 = vpop.permute.xlu1 %95 }
  0xa7   :  { %583 = vmatprep.subr.msk.mxu0 %vm59_vm2, %v194_v29 }
  0xa8   :  { %584 = vmatpush3.msk.msra.mxu0 %vm47_vm6, %v96_v30 }
  0xaa   :  { %v150_v31 = vpop.permute.xlu0 %149  ;;  %v45_v32 = vpop.permute.xlu1 %44 }
  0xab   :  { %585 = vmatprep.subr.msk.mxu0 %vm59_vm2, %v150_v31 }
  0xac   :  { %586 = vmatpush3.msk.msra.mxu0 %vm47_vm6, %v45_v32 }
  0xae   :  { %v189_v33 = vpop.permute.xlu0 %188  ;;  %v91_v34 = vpop.permute.xlu1 %90 }
  0xaf   :  { %587 = vmatprep.subr.msk.mxu0 %vm53_vm4, %v189_v33 }
  0xb0   :  { %588 = vmatpush3.msk.msra.mxu0 %vm41_vm7, %v91_v34 }
  0xb2   :  { %v145_v35 = vpop.permute.xlu0 %144  ;;  %v39_v36 = vpop.permute.xlu1 %38 }
  0xb3   :  { %589 = vmatprep.subr.msk.mxu0 %vm53_vm4, %v145_v35 }
  0xb4   :  { %590 = vmatpush3.msk.msra.mxu0 %vm41_vm7, %v39_v36 }
  0xb6   :  { %v111_v37 = vpop.permute.xlu0 %110  ;;  %v63_v38 = vpop.permute.xlu1 %62 }
  0xb7   :  { %591 = vmatprep.subr.msk.mxu0 %vm65_vm8, %v111_v37 }
  0xb8   :  { %592 = vmatpush3.msra.mxu0 %v773_v2 }
  0xb9   :  { %593 = vmatprep.subr.msk.mxu0 %vm65_vm8, %v63_v38 }
  0xba   :  { %v214_v41 = vpop.permute.xlu0 %213  ;;  %594 = vmatpush3.msra.mxu0 %v778_v3  ;;  %v170_v42 = vpop.permute.xlu1 %169 }
  0xbb   :  { %368 = vmatmul.mubr.f32.vlgmr.msra.gmra.mxu0 %v218_v39  ;;  %615 = vmatprep.subr.msk.mxu1 %vm83_vm3, %v214_v41 }
  0xbc   :  { %616 = vmatpush3.msk.msra.mxu1 %vm83_vm3, %v214_v41  ;;  %372 = vmatprep.mubr.f32.mxu0 %v222_v40 }
  0xbd   :  { %617 = vmatprep.subr.msk.mxu1 %vm83_vm3, %v170_v42 }
  0xbe   :  { %v209_v45 = vpop.permute.xlu0 %208  ;;  %618 = vmatpush3.msk.msra.mxu1 %vm83_vm3, %v170_v42  ;;  %v165_v46 = vpop.permute.xlu1 %164 }
  0xbf   :  { %373 = vmatmul.mubr.f32.gmra.mxu0 %v221_v43  ;;  %619 = vmatprep.subr.msk.mxu1 %vm77_vm5, %v209_v45 }
  0xc0   :  { %620 = vmatpush3.msk.msra.mxu1 %vm77_vm5, %v209_v45  ;;  %377 = vmatprep.mubr.f32.mxu0 %v225_v44 }
  0xc1   :  { %621 = vmatprep.subr.msk.mxu1 %vm77_vm5, %v165_v46 }
  0xc2   :  { %622 = vmatpush3.msk.msra.mxu1 %vm77_vm5, %v165_v46 }
  0xc3   :  { %378 = vmatmul.mubr.f32.gmra.mxu0 %v224_v47  ;;  %624 = vmatmul.mubr.msk.f32.vlgmr.msra.gmra.mxu1 %vm290_vm0, %v223_v48 }
  0xc4   :  { %382 = vmatprep.mubr.f32.mxu0 %v228_v49  ;;  %626 = vmatprep.mubr.msk.f32.mxu1 %vm290_vm0, %v226_v50 }
  0xc7   :  { %383 = vmatmul.mubr.f32.gmra.mxu0 %v227_v51  ;;  %627 = vmatmul.mubr.msk.f32.gmra.mxu1 %vm290_vm0, %v229_v52 }
  0xcb   :  { %v278_v57 = vpop.permute.xlu1 %277  ;;  %v273_v58 = vpop.permute.xlu0 %272 }
  0xcf   :  { %v283_v7 = vpop.permute.xlu1 %282  ;;  %v288_v17 = vpop.permute.xlu0 %287 }
 0x17b   :  { %v595_v53 = vpop.f32.mrf.mxu0 }
 0x17d   :  { %v596_v54 = vpop.f32.mrf.mxu0 }
 0x17e   :  { %v597_v56 = vadd.f32 %v596_v54, %v595_v53 }
 0x17f   :  { %v598_v55 = vpop.f32.mrf.mxu0 }
 0x180   :  { %v370_v63 = vadd.f32 %v597_v56, %v273_v58 }
 0x181   :  { %v599_v59 = vpop.f32.mrf.mxu0 }
 0x182   :  { %v600_v60 = vadd.f32 %v599_v59, %v598_v55 }
 0x183   :  { %v601_v61 = vpop.f32.mrf.mxu0  ;;  %v625_v62 = vpop.f32.mrf.mxu1 }
 0x184   :  { %v375_v0 = vadd.f32 %v600_v60, %v278_v57 }
 0x185   :  { %v602_v1 = vpop.f32.mrf.mxu0  ;;  %v454_v2 = vpop.f32.mrf.mxu1 }
 0x186   :  { %v460_v3 = vadd.f32 %v625_v62, %v375_v0  ;;  %v603_v4 = vadd.f32 %v602_v1, %v601_v61  ;;  %v455_v5 = vadd.f32 %v454_v2, %v370_v63 }
 0x187   :  { %v604_v8 = vpop.f32.mrf.mxu0  ;;  %v628_v9 = vpop.f32.mrf.mxu1 }
 0x188   :  { %v474_v10 = vmax.f32 %v460_v3, 0.0  ;;  %v473_v11 = vmax.f32 %v455_v5, 0.0  ;;  %v380_v12 = vadd.f32 %v603_v4, %v283_v7 }
 0x189   :  { %v605_v13 = vpop.f32.mrf.mxu0  ;;  %v464_v14 = vpop.f32.mrf.mxu1 }
 0x18a   :  { %vm477_vm9 = vcmp.gt.f32.partialorder %v474_v10, %v473_v11  ;;  %v606_v15 = vadd.f32 %v605_v13, %v604_v8  ;;  %v465_v16 = vadd.f32 %v464_v14, %v380_v12 }
 0x18b   :  { %v478_v20 = vsel %vm477_vm9, %v474_v10, %v473_v11  ;;  %v479_v23 = vsel %vm477_vm9, 1, %v722_v6 }
 0x18c   :  { %v385_v18 = vadd.f32 %v606_v15, %v288_v17  ;;  %v475_v19 = vmax.f32 %v465_v16, 0.0 }
 0x18e   :  { %v470_v21 = vadd.f32 %v628_v9, %v385_v18  ;;  %vm480_vm10 = vcmp.gt.f32.partialorder %v475_v19, %v478_v20 }
 0x18f   :  { %v481_v24 = vsel %vm480_vm10, %v475_v19, %v478_v20  ;;  %v482_v26 = vsel %vm480_vm10, 12, %v479_v23 }
 0x190   :  { %v476_v22 = vmax.f32 %v470_v21, 0.0 }
 0x192   :  { %vm483_vm11 = vcmp.gt.f32.partialorder %v476_v22, %v481_v24 }
 0x193   :  { %v484_v27 = vsel %vm483_vm11, %v476_v22, %v481_v24  ;;  %v485_v28 = vsel %vm483_vm11, 13, %v482_v26 }
 0x194   :  { %486 = vst [vmem:[#allocation6] sm:$0xff] %v484_v27  ;;  %v492_v29 = vadd.s32 %v530_v25, %v485_v28 }
 0x195   :  { %676 = shalt.err (!%p673_p9)
}
 0x196   :  { %503 = dma.vmem_to_hbm [thread:$0]  %s501_s22, 128, %s890_s4, [#allocation5]   ;;  %493 = vst [vmem:[#allocation7] sm:$0xff] %v492_v29 }
 0x197   :  { %s685_s3 = scalar_lea.vmem %s511_s26, 128  ;;  %p690_p11 = scmp.lt.s32.totalorder %s511_s26, %s511_s26 }
 0x198   :  { %p686_p10 = scmp.ne.s32.totalorder %s511_s26, %s685_s3  ;;  %p691_p12 = scmp.lt.s32.totalorder %s685_s3, %s685_s3 }
 0x19a   :  { %p692_p13 = por %p691_p12, %p690_p11 }
 0x19c   :  { %p693_p0 = pnand %p692_p13, %p686_p10 }
 0x19e   :  { %696 = shalt.err (!%p693_p0)
}
 0x19f   :  { %513 = dma.vmem_to_hbm [thread:$0]  %s511_s26, 128, %s891_s5, [#allocation8]  }
 0x1a0   :  { %707 = dma.done.wait [#allocation5], 128  }
 0x1a1   :  { %708 = vsyncadd [#allocation5], 4294967168 }
 0x1a2   :  { %709 = dma.done.wait [#allocation8], 128  }
 0x1a3   :  { %710 = vsyncadd [#allocation8], 4294967168 }
 0x1a4   :  { %520 = vsyncpa [#allocation4], 1 }
 0x1a5   :  { %521 = vsyncpa [#allocation5], 1 }
 0x1a6   :  { %522 = vsyncpa [#allocation8], 1 }

</bundles_post_ra>
